<compile_context>
chip_gen: v5e
topology: v5e:2x2
jax: 0.10.0
libtpu: 0.0.40
codegen_flags: <defaults>
</compile_context>

<pallas_src>
import jax
import jax.numpy as jnp
from jax.experimental import pallas as pl
from jax.experimental.pallas import tpu as pltpu


def _round_up(n, m):
    return ((n + m - 1) // m) * m


def _mlp_kernel(x_ref, w12_ref, pk_ref, o_ref):
    # x arrives as f32 (no wrapper pre-cast); cast in-register for the MXU.
    xb = x_ref[...].astype(jnp.bfloat16)
    # Layer 1 was folded into layer 2 in the wrapper, so one bf16 x bf16 -> f32
    # MXU pass produces the pre-sigmoid hidden state.
    h = jnp.dot(xb, w12_ref[...], preferred_element_type=jnp.float32)
    # pk_ref rows: 0 = fused bias b12, 1 = w3 row, 2 = b3 (broadcast).
    h = jax.nn.sigmoid(h + pk_ref[0:1, :])  # EUP, f32 accumulator (v5e-safe)
    # Final 32 -> 1 projection: VPU multiply + lane reduce (XLU) instead of a
    # near-empty MXU matmul; those slots have slack in this mem-bound kernel.
    o_ref[...] = (jnp.sum(h * pk_ref[1:2, :], axis=1, keepdims=True)
                  + pk_ref[2:3, 0:1])


def _pick_tile_rows(B, F, *, target_bytes=4 << 20, elt_bytes=4):
    """~4 MiB of f32 x per tile, 16-row aligned, and >=2 grid steps on large
    batches so v7x megacore feeds both TensorCores."""
    tb = max(16, (target_bytes // (elt_bytes * max(F, 1))) // 16 * 16)
    if B > 16:
        tb = min(tb, _round_up(-(-B // 2), 16))   # at least 2 grid steps
    tb = min(tb, _round_up(B, 16))
    return tb


def triple_layer_net(x, params, mask=None, indices=None):
    """Fused TripleLayerNet forward. x: (B, N_features) f32.
    mask/indices are unused (matches the PyTorch reference forward)."""
    w1, b1, w2, b2, w3, b3 = params
    B, F = x.shape

    # ---- wrapper-side algebra (tiny, done once) ----------------------------
    # sigmoid((x@w1 + b1) @ w2 + b2) == sigmoid(x @ (w1@w2) + (b1@w2 + b2))
    w12 = (w1 @ w2).astype(jnp.bfloat16)              # (F, 32) fused weight
    b12 = (b1 @ w2 + b2).astype(jnp.float32)          # (1, 32) fused bias
    w3t = w3.T.astype(jnp.float32)                    # (1, 32) row for VPU tail
    packed = jnp.concatenate(
        [b12, w3t, jnp.broadcast_to(b3.astype(jnp.float32), (1, 32))],
        axis=0)                                       # (3, 32) resident operand

    # ---- batch tiling (no HBM padding of x; ragged last tile is masked) ----
    tb = _pick_tile_rows(B, F)
    grid = (pl.cdiv(B, tb),)

    cost = pl.CostEstimate(
        flops=2 * B * (F * 32 + 32),
        transcendentals=B * 32,
        bytes_accessed=B * F * 4 + B * 4 + w12.size * 2 + packed.size * 4,
    )

    return pl.pallas_call(
        _mlp_kernel,
        out_shape=jax.ShapeDtypeStruct((B, 1), jnp.float32),
        grid=grid,
        in_specs=[
            pl.BlockSpec((tb, F), lambda i: (i, 0)),   # x: f32, streamed per tile
            pl.BlockSpec((F, 32), lambda i: (0, 0)),   # fused weight: VMEM-resident
            pl.BlockSpec((3, 32), lambda i: (0, 0)),   # b12 / w3 row / b3: resident
        ],
        out_specs=pl.BlockSpec((tb, 1), lambda i: (i, 0)),
        compiler_params=pltpu.CompilerParams(
            dimension_semantics=("parallel",),    # megacore split on v7x
            vmem_limit_bytes=48 * 1024 * 1024,    # > v5e/v6e defaults, < v7x 64 MiB
        ),
        cost_estimate=cost,
    )(x, w12, packed)


def init_params(key, n_features):
    """Deterministic init mimicking nn.Linear (weights stored as (in, out))."""
    ks = jax.random.split(key, 6)

    def linear(kw, kb, fan_in, fan_out):
        bound = 1.0 / jnp.sqrt(fan_in)
        w = jax.random.uniform(kw, (fan_in, fan_out), jnp.float32, -bound, bound)
        b = jax.random.uniform(kb, (1, fan_out), jnp.float32, -bound, bound)
        return w, b

    w1, b1 = linear(ks[0], ks[1], n_features, 64)
    w2, b2 = linear(ks[2], ks[3], 64, 32)
    w3, b3 = linear(ks[4], ks[5], 32, 1)
    return (w1, b1, w2, b2, w3, b3)


def reference(x, params):
    """Exact f32, unfused reference (mirrors the PyTorch forward)."""
    w1, b1, w2, b2, w3, b3 = params
    h1 = x @ w1 + b1
    h2 = jax.nn.sigmoid(h1 @ w2 + b2)
    return h2 @ w3 + b3


if __name__ == "__main__":
    key = jax.random.PRNGKey(0)
    k_x, k_p = jax.random.split(key)

    batch, n_features = 10, 32        # non-multiple-of-16 batch exercises ragged tile
    x = jax.random.normal(k_x, (batch, n_features), jnp.float32)
    mask = jnp.ones((batch,), jnp.float32)          # unused by forward
    indices = jnp.arange(batch, dtype=jnp.int32)    # unused by forward

    params = init_params(k_p, n_features)

    fwd = jax.jit(triple_layer_net)
    out = jax.block_until_ready(fwd(x, params, mask, indices))

    ref = reference(x, params)
    assert out.shape == (batch, 1)
    # Tolerance re-baselined for in-kernel bf16 x + bf16 fused layer-1/2 weight.
    assert jnp.allclose(out, ref, atol=2e-2, rtol=2e-2), "mismatch vs reference"
    print("KERNEL_OK")
</pallas_src>

<mosaic_0001>
module attributes {stable_mosaic.version = 11 : i64} {
  func.func @_mlp_kernel(%arg0: i32, %arg1: memref<16x32xf32, #tpu.memory_space<vmem>>, %arg2: memref<32x32xbf16, #tpu.memory_space<vmem>>, %arg3: memref<3x32xf32, #tpu.memory_space<vmem>>, %arg4: memref<16x1xf32, #tpu.memory_space<vmem>>) attributes {dimension_semantics = [#tpu.dimension_semantics<parallel>], iteration_bounds = array<i64: 1>, scalar_prefetch = 0 : i64, scratch_operands = 0 : i64, tpu.core_type = #tpu.core_type<tc>, window_params = [{transform_indices = @transform_0, window_bounds = array<i64: 16, 32>}, {pipeline_mode = #tpu.pipeline_mode<synchronous>, transform_indices = @transform_1, window_bounds = array<i64: 32, 32>}, {pipeline_mode = #tpu.pipeline_mode<synchronous>, transform_indices = @transform_2, window_bounds = array<i64: 3, 32>}, {transform_indices = @transform_3, window_bounds = array<i64: 16, 1>}]} {
    %c0 = arith.constant 0 : index
    %c0_0 = arith.constant 0 : index
    %0 = vector.load %arg1[%c0, %c0_0] : memref<16x32xf32, #tpu.memory_space<vmem>>, vector<16x32xf32>
    %1 = arith.truncf %0 : vector<16x32xf32> to vector<16x32xbf16>
    %c0_1 = arith.constant 0 : index
    %c0_2 = arith.constant 0 : index
    %2 = vector.load %arg2[%c0_1, %c0_2] : memref<32x32xbf16, #tpu.memory_space<vmem>>, vector<32x32xbf16>
    %cst = arith.constant dense<0.000000e+00> : vector<16x32xf32>
    %3 = tpu.matmul %1, %2, %cst {dimension_numbers = #tpu.dot_dimension_numbers<[1], [0], [0], [1], [0, 0, 1, 1], [], []>} : vector<16x32xbf16>, vector<32x32xbf16>, vector<16x32xf32> -> vector<16x32xf32>
    %c0_3 = arith.constant 0 : index
    %c0_4 = arith.constant 0 : index
    %4 = vector.load %arg3[%c0_3, %c0_4] : memref<3x32xf32, #tpu.memory_space<vmem>>, vector<1x32xf32>
    %5 = vector.broadcast %4 : vector<1x32xf32> to vector<16x32xf32>
    %6 = arith.addf %3, %5 : vector<16x32xf32>
    %7 = arith.negf %6 : vector<16x32xf32>
    %8 = math.exp %7 : vector<16x32xf32>
    %cst_5 = arith.constant 1.000000e+00 : f32
    %9 = vector.broadcast %cst_5 : f32 to vector<16x32xf32>
    %10 = arith.addf %9, %8 : vector<16x32xf32>
    %11 = arith.divf %9, %10 : vector<16x32xf32>
    %c1 = arith.constant 1 : index
    %c0_6 = arith.constant 0 : index
    %12 = vector.load %arg3[%c1, %c0_6] : memref<3x32xf32, #tpu.memory_space<vmem>>, vector<1x32xf32>
    %13 = vector.broadcast %12 : vector<1x32xf32> to vector<16x32xf32>
    %14 = arith.mulf %11, %13 : vector<16x32xf32>
    %cst_7 = arith.constant dense<0.000000e+00> : vector<16xf32>
    %15 = vector.multi_reduction <add>, %14, %cst_7 [1] : vector<16x32xf32> to vector<16xf32>
    %16 = vector.shape_cast %15 : vector<16xf32> to vector<16x1xf32>
    %c2 = arith.constant 2 : index
    %c0_8 = arith.constant 0 : index
    %17 = vector.load %arg3[%c2, %c0_8] : memref<3x32xf32, #tpu.memory_space<vmem>>, vector<1x1xf32>
    %18 = vector.broadcast %17 : vector<1x1xf32> to vector<16x1xf32>
    %19 = arith.addf %16, %18 : vector<16x1xf32>
    %c0_9 = arith.constant 0 : index
    %c0_10 = arith.constant 0 : index
    %20 = vector.load %arg4[%c0_9, %c0_10] : memref<16x1xf32, #tpu.memory_space<vmem>>, vector<16x1xf32>
    tpu.vector_store %arg4[%c0_9, %c0_10], %19 {strides = array<i32>} : memref<16x1xf32, #tpu.memory_space<vmem>>, vector<16x1xf32>,
    return
  }
  func.func @transform_0(%arg0: i32) -> (i32, i32) {
    %c0_i32 = arith.constant 0 : i32
    %c0_i32_0 = arith.constant 0 : i32
    return %arg0, %c0_i32 : i32, i32
  }
  func.func @transform_1(%arg0: i32) -> (i32, i32) {
    %c0_i32 = arith.constant 0 : i32
    %c0_i32_0 = arith.constant 0 : i32
    %c0_i32_1 = arith.constant 0 : i32
    return %c0_i32, %c0_i32_0 : i32, i32
  }
  func.func @transform_2(%arg0: i32) -> (i32, i32) {
    %c0_i32 = arith.constant 0 : i32
    %c0_i32_0 = arith.constant 0 : i32
    %c0_i32_1 = arith.constant 0 : i32
    return %c0_i32, %c0_i32_0 : i32, i32
  }
  func.func @transform_3(%arg0: i32) -> (i32, i32) {
    %c0_i32 = arith.constant 0 : i32
    %c0_i32_0 = arith.constant 0 : i32
    return %arg0, %c0_i32 : i32, i32
  }
}

</mosaic_0001>

<bundles_post_ra>
// kernel: triple_layer_net.1
= control target key start
LH: loop header
LB: loop body
LE: loop exit
PB: predicated region body
PF: predicated region fallthrough
CT: control target
= control target key end

     0   :  { %vm36_vm0 = vcmask 261120   ;;  %vm106_vm9 = vcmask 7168   ;;  %s187_s1 = inlined_call_operand.vmem [shape: bf16[32,32], index: 1, kind: input, shape index: {}]   ;;  %s188_s0 = inlined_call_operand.vmem [shape: f32[10,32], index: 0, kind: input, shape index: {}]   ;;  %s189_s2 = inlined_call_operand.vmem [shape: f32[3,32], index: 2, kind: input, shape index: {}]   ;;  %s190_s3 = inlined_call_operand.vmem [shape: f32[10,1], index: 3, kind: output, shape index: {}]  }
   0x1   :  { %v125_v0 = vld [vmem:[%s187_s1 + $0x8] sm:$0xff]  ;;  %v124_v1 = vld [vmem:[%s187_s1] sm:$0xff] }
   0x2   :  { %v15_v2 = vld [vmem:[%s188_s0] sm:$0xff]  ;;  %46 = vmatpush.bf16.msra.mxu0 %v125_v0  ;;  %v16_v3 = vld [vmem:[%s188_s0 + $0x8] sm:$0xff] }
   0x3   :  { %v17_v4 = vpack.c.bf16 %v16_v3, %v15_v2  ;;  %v126_v5 = vld [vmem:[%s189_s2] ss:$0 sm:$0xff]  ;;  %v127_v23 = vld [vmem:[%s189_s2 + $0x1] ss:$0 sm:$0xff]  ;;  %v128_v41 = vld [vmem:[%s189_s2 + $0x2] ss:$0 sm:$0xff] }
   0x6   :  { %47 = vmatpush.bf16.msra.mxu0 %v124_v1 }
   0x9   :  { %121 = vmatmul.msk.bf16.vlgmr.msra.gmra.mxu0 %vm36_vm0, %v17_v4 }
  0x86   :  { %v49_v6 = vpop.f32.mrf.mxu0 }
  0x87   :  { %v50_v7 = vadd.f32 %v126_v5, %v49_v6 }
  0x89   :  { %v122_v8 = vmul.f32 -1.442695, %v50_v7 }
  0x8b   :  { %129 = vpow2.f32 %v122_v8 }
  0x8e   :  { %v51_v9 = vpop.f32.mrf.mxu0 }
  0x8f   :  { %v52_v10 = vadd.f32 %v126_v5, %v51_v9 }
  0x91   :  { %v130_v11 = vpop.eup %129  ;;  %v123_v12 = vmul.f32 -1.442695, %v52_v10 }
  0x92   :  { %v60_v13 = vadd.f32 1.0, %v130_v11 }
  0x93   :  { %131 = vpow2.f32 %v123_v12 }
  0x94   :  { %133 = vrcp.f32 %v60_v13  ;;  %v73_v19 = vand.u32 2147483648, %v60_v13  ;;  %v71_v21 = vand.u32 2147483647, %v60_v13  ;;  %vm67_vm2 = vweird.f32 %v60_v13 }
  0x96   :  { %v74_v25 = vor.u32 1.1754944e-38, %v73_v19  ;;  %vm72_vm4 = vcmp.eq.f32.partialorder %v71_v21, 8.507059e+37 }
  0x99   :  { %v132_v14 = vpop.eup %131 }
  0x9a   :  { %v134_v15 = vpop.eup %133  ;;  %v61_v16 = vadd.f32 1.0, %v132_v14 }
  0x9b   :  { %v63_v17 = vmul.f32 %v134_v15, %v60_v13  ;;  %vm68_vm1 = vweird.f32 %v134_v15 }
  0x9c   :  { %135 = vrcp.f32 %v61_v16  ;;  %vm69_vm3 = vmor %vm67_vm2, %vm68_vm1  ;;  %v88_v31 = vand.u32 2147483648, %v61_v16  ;;  %v86_v34 = vand.u32 2147483647, %v61_v16  ;;  %vm82_vm6 = vweird.f32 %v61_v16 }
  0x9d   :  { %v64_v18 = vsub.f32 1.0, %v63_v17 }
  0x9e   :  { %v89_v36 = vor.u32 1.1754944e-38, %v88_v31  ;;  %vm87_vm8 = vcmp.eq.f32.partialorder %v86_v34, 8.507059e+37 }
  0x9f   :  { %v65_v20 = vmul.f32 %v134_v15, %v64_v18 }
  0xa1   :  { %v66_v22 = vadd.f32 %v134_v15, %v65_v20 }
  0xa2   :  { %v136_v24 = vpop.eup %135 }
  0xa3   :  { %v70_v26 = vsel %vm69_vm3, %v134_v15, %v66_v22  ;;  %v78_v27 = vmul.f32 %v136_v24, %v61_v16  ;;  %vm83_vm5 = vweird.f32 %v136_v24 }
  0xa4   :  { %v75_v28 = vsel %vm72_vm4, %v74_v25, %v70_v26  ;;  %vm84_vm7 = vmor %vm82_vm6, %vm83_vm5 }
  0xa5   :  { %v94_v29 = vmul.f32 %v127_v23, %v75_v28  ;;  %v79_v30 = vsub.f32 1.0, %v78_v27 }
  0xa7   :  { %v96_v32 = vsel %vm36_vm0, %v94_v29, 0.0  ;;  %v80_v33 = vmul.f32 %v136_v24, %v79_v30 }
  0xa8   :  { %97 = vadd.xlane.f32.xlu0 %v96_v32 }
  0xa9   :  { %v81_v35 = vadd.f32 %v136_v24, %v80_v33 }
  0xab   :  { %v85_v37 = vsel %vm84_vm7, %v136_v24, %v81_v35 }
  0xac   :  { %v90_v38 = vsel %vm87_vm8, %v89_v36, %v85_v37 }
  0xad   :  { %v95_v39 = vmul.f32 %v127_v23, %v90_v38 }
  0xaf   :  { %v99_v40 = vsel %vm36_vm0, %v95_v39, 0.0 }
  0xb0   :  { %100 = vadd.xlane.f32.xlu0 %v99_v40 }
 0x11b   :  { %v98_v42 = vpop.xlane.xlu0 %97 }
 0x11c   :  { %v104_v43 = vadd.f32 %v128_v41, %v98_v42 }
 0x11e   :  { %107 = vst.msk [vmem:[%s190_s3] sm:$0xff] %vm106_vm9, %v104_v43 }
 0x123   :  { %v101_v44 = vpop.xlane.xlu0 %100 }
 0x124   :  { %v105_v45 = vadd.f32 %v128_v41, %v101_v44 }
 0x126   :  { %108 = vst.msk [vmem:[%s190_s3 + $0x8] sm:$0xff] %vm106_vm9, %v105_v45 }

</bundles_post_ra>
